<compile_context>
chip_gen: v5e
topology: v5e:2x2
jax: 0.10.0
libtpu: 0.0.40
codegen_flags: <defaults>
</compile_context>

<pallas_src>
import functools

import jax
import jax.numpy as jnp
from jax.experimental import pallas as pl
from jax.experimental.pallas import tpu as pltpu

NEG_SLOPE = 0.01  # MyLeakyReLU negative_slope
LANE = 128        # TPU lane width


def _round_up(n, m):
    return ((n + m - 1) // m) * m


def _my_leaky_relu(x):
    # torch.clamp(x, min=0) + torch.clamp(x, max=0) * slope   (kept in f32)
    return jnp.maximum(x, 0.0) + jnp.minimum(x, 0.0) * NEG_SLOPE


def _generator_kernel(n_hidden_layers, compute_dtype, x_ref, *refs):
    """Fused MLP: Linear -> [act, Linear] * g_layers -> act -> Linear.

    refs = (W0, b0, W1, b1, ..., W_last, b_last, out_ref)
    Weights arrive in `compute_dtype` (bf16 by default); biases in f32.
    All dots accumulate in f32 on the MXU; activations run in f32 on the VPU.
    """
    out_ref = refs[-1]
    wb = refs[:-1]

    # Cast the input tile to the matmul operand dtype inside the kernel
    # (keeps the x BlockSpec in plain f32 layout).
    h = x_ref[...].astype(compute_dtype)

    # first_layer
    h = jnp.dot(h, wb[0][...], preferred_element_type=jnp.float32) + wb[1][...]
    idx = 2
    # hidden layers: activation_i, layer_i
    for _ in range(n_hidden_layers):
        h = _my_leaky_relu(h)                              # f32 VPU
        h = jnp.dot(h.astype(compute_dtype), wb[idx][...],
                    preferred_element_type=jnp.float32) + wb[idx + 1][...]
        idx += 2
    # last_activation, last_layer (output lanes are zero-padded to 128)
    h = _my_leaky_relu(h)
    h = jnp.dot(h.astype(compute_dtype), wb[idx][...],
                preferred_element_type=jnp.float32) + wb[idx + 1][...]

    out_ref[...] = h.astype(out_ref.dtype)


def generator_forward(x, weights, biases, *, tm=None, use_bf16=True):
    """Run the Generator MLP with a single fused Pallas kernel.

    x:       (B, z_dim_eff) float32
    weights: list of (in, out) float32 matrices
    biases:  list of (1, out) float32 row vectors
    """
    B, z_dim_eff = x.shape
    n_layers = len(weights)
    g_layers = n_layers - 2
    x_dim = weights[-1].shape[1]
    out_pad = _round_up(x_dim, LANE)     # lane-dense output width

    compute_dtype = jnp.bfloat16 if use_bf16 else jnp.float32

    if tm is None:
        # Big enough to amortize per-step overhead, small enough to keep
        # (tm, g_dim) f32 activations comfortably in vregs/VMEM; keep >= 2
        # grid steps when possible so v7x can use both TensorCores.
        tm = max(8, min(256, _round_up(pl.cdiv(B, 2), 8)))
    grid = (pl.cdiv(B, tm),)

    # Zero-pad the last layer to a 128-lane-wide output (unmasked stores).
    w_last = jnp.pad(weights[-1], ((0, 0), (0, out_pad - x_dim)))
    b_last = jnp.pad(biases[-1], ((0, 0), (0, out_pad - x_dim)))
    weights = list(weights[:-1]) + [w_last]
    biases = list(biases[:-1]) + [b_last]

    # bf16 matmul operands; biases stay f32 so bias-add / leaky-ReLU are f32.
    weights = [w.astype(compute_dtype) for w in weights]

    in_specs = [pl.BlockSpec((tm, z_dim_eff), lambda i: (i, 0))]
    args = [x]
    for W, b in zip(weights, biases):
        # Grid-invariant (full-array) blocks; Pallas keeps them resident.
        in_specs.append(pl.BlockSpec(W.shape, lambda i: (0, 0)))
        in_specs.append(pl.BlockSpec(b.shape, lambda i: (0, 0)))
        args.append(W)
        args.append(b)

    out_specs = pl.BlockSpec((tm, out_pad), lambda i: (i, 0))

    kernel = functools.partial(_generator_kernel, g_layers, compute_dtype)

    out = pl.pallas_call(
        kernel,
        out_shape=jax.ShapeDtypeStruct((B, out_pad), jnp.float32),
        grid_spec=pltpu.PrefetchScalarGridSpec(
            num_scalar_prefetch=0,
            grid=grid,
            in_specs=in_specs,
            out_specs=out_specs,
        ),
        compiler_params=pltpu.CompilerParams(
            dimension_semantics=("parallel",)
        ),
    )(*args)

    return out[:, :x_dim]


def init_generator_params(key, params):
    """Deterministic init matching the shapes of Generator.__init__.

    Linear weights use kaiming_normal_ (fan_in, gain=sqrt(2)); biases use
    PyTorch's default uniform(-1/sqrt(fan_in), 1/sqrt(fan_in)).
    Weights are returned transposed to (in, out) for the kernel layout.
    """
    z_dim = params["z_dim"] + len(params["cond_keys"])
    x_dim = params["x_dim"] - len(params["cond_keys"])
    g_dim = params["g_dim"]
    g_l = params["g_layers"]

    dims = [(z_dim, g_dim)] + [(g_dim, g_dim)] * g_l + [(g_dim, x_dim)]

    weights, biases = [], []
    for (fan_in, fan_out) in dims:
        key, kw, kb = jax.random.split(key, 3)
        std = (2.0 / fan_in) ** 0.5  # kaiming_normal_, gain=sqrt(2)
        W = std * jax.random.normal(kw, (fan_in, fan_out), dtype=jnp.float32)
        bound = 1.0 / (fan_in ** 0.5)
        b = jax.random.uniform(
            kb, (1, fan_out), dtype=jnp.float32, minval=-bound, maxval=bound
        )
        weights.append(W)
        biases.append(b)
    return weights, biases


def generator_reference(x, weights, biases, compute_dtype=jnp.float32):
    """Pure-JAX reference of the same forward pass.

    With compute_dtype=bfloat16 it emulates the kernel's operand precision
    (bf16 matmul operands, f32 accumulation, f32 bias/activation).
    """
    cd = compute_dtype
    h = jnp.dot(x.astype(cd), weights[0].astype(cd),
                preferred_element_type=jnp.float32) + biases[0]
    for W, b in zip(weights[1:-1], biases[1:-1]):
        h = _my_leaky_relu(h)
        h = jnp.dot(h.astype(cd), W.astype(cd),
                    preferred_element_type=jnp.float32) + b
    h = _my_leaky_relu(h)
    return jnp.dot(h.astype(cd), weights[-1].astype(cd),
                   preferred_element_type=jnp.float32) + biases[-1]


# TODO(synk): forward_with_norm / forward_with_post_processing (x_mean/x_std
# denorm + injected post_process callback) are runtime-patched methods, not
# part of the base forward; not implemented here.

if __name__ == "__main__":
    # Module hyper-params (small, consistent with the Generator __init__).
    gen_params = {
        "z_dim": 8,
        "x_dim": 4,
        "cond_keys": [],          # no conditioning keys
        "g_dim": 32,
        "g_layers": 2,
        "activation": "my_leaky_relu",
    }

    key = jax.random.PRNGKey(0)
    key, kx = jax.random.split(key)

    batch = 16
    z_dim_eff = gen_params["z_dim"] + len(gen_params["cond_keys"])
    x = jax.random.normal(kx, (batch, z_dim_eff), dtype=jnp.float32)

    weights, biases = init_generator_params(key, gen_params)

    out = generator_forward(x, weights, biases)   # auto tile: tm=8, grid=(2,)
    out = jax.block_until_ready(out)

    x_dim_out = gen_params["x_dim"] - len(gen_params["cond_keys"])
    assert out.shape == (batch, x_dim_out)

    # Tight check against a reference that matches the kernel's bf16-operand /
    # f32-accumulate precision.
    ref_bf16 = generator_reference(x, weights, biases,
                                   compute_dtype=jnp.bfloat16)
    assert jnp.allclose(out, ref_bf16, atol=5e-3, rtol=5e-3)

    # Loose check against the full-f32 reference (bf16 operand rounding).
    ref_f32 = generator_reference(x, weights, biases)
    assert jnp.allclose(out, ref_f32, atol=1e-1, rtol=1e-1)

    print("KERNEL_OK")
</pallas_src>

<mosaic_0001>
module attributes {stable_mosaic.version = 11 : i64} {
  func.func @_generator_kernel(%arg0: i32, %arg1: memref<8x8xf32, #tpu.memory_space<vmem>>, %arg2: memref<8x32xbf16, #tpu.memory_space<vmem>>, %arg3: memref<1x32xf32, #tpu.memory_space<vmem>>, %arg4: memref<32x32xbf16, #tpu.memory_space<vmem>>, %arg5: memref<1x32xf32, #tpu.memory_space<vmem>>, %arg6: memref<32x32xbf16, #tpu.memory_space<vmem>>, %arg7: memref<1x32xf32, #tpu.memory_space<vmem>>, %arg8: memref<32x128xbf16, #tpu.memory_space<vmem>>, %arg9: memref<1x128xf32, #tpu.memory_space<vmem>>, %arg10: memref<8x128xf32, #tpu.memory_space<vmem>>) attributes {dimension_semantics = [#tpu.dimension_semantics<parallel>], iteration_bounds = array<i64: 2>, scalar_prefetch = 0 : i64, scratch_operands = 0 : i64, tpu.core_type = #tpu.core_type<tc>, window_params = [{transform_indices = @transform_0, window_bounds = array<i64: 8, 8>}, {pipeline_mode = #tpu.pipeline_mode<synchronous>, transform_indices = @transform_1, window_bounds = array<i64: 8, 32>}, {pipeline_mode = #tpu.pipeline_mode<synchronous>, transform_indices = @transform_2, window_bounds = array<i64: 1, 32>}, {pipeline_mode = #tpu.pipeline_mode<synchronous>, transform_indices = @transform_3, window_bounds = array<i64: 32, 32>}, {pipeline_mode = #tpu.pipeline_mode<synchronous>, transform_indices = @transform_4, window_bounds = array<i64: 1, 32>}, {pipeline_mode = #tpu.pipeline_mode<synchronous>, transform_indices = @transform_5, window_bounds = array<i64: 32, 32>}, {pipeline_mode = #tpu.pipeline_mode<synchronous>, transform_indices = @transform_6, window_bounds = array<i64: 1, 32>}, {pipeline_mode = #tpu.pipeline_mode<synchronous>, transform_indices = @transform_7, window_bounds = array<i64: 32, 128>}, {pipeline_mode = #tpu.pipeline_mode<synchronous>, transform_indices = @transform_8, window_bounds = array<i64: 1, 128>}, {transform_indices = @transform_9, window_bounds = array<i64: 8, 128>}]} {
    %c0 = arith.constant 0 : index
    %c0_0 = arith.constant 0 : index
    %0 = vector.load %arg1[%c0, %c0_0] : memref<8x8xf32, #tpu.memory_space<vmem>>, vector<8x8xf32>
    %1 = arith.truncf %0 : vector<8x8xf32> to vector<8x8xbf16>
    %c0_1 = arith.constant 0 : index
    %c0_2 = arith.constant 0 : index
    %2 = vector.load %arg2[%c0_1, %c0_2] : memref<8x32xbf16, #tpu.memory_space<vmem>>, vector<8x32xbf16>
    %cst = arith.constant dense<0.000000e+00> : vector<8x32xf32>
    %3 = tpu.matmul %1, %2, %cst {dimension_numbers = #tpu.dot_dimension_numbers<[1], [0], [0], [1], [0, 0, 1, 1], [], []>} : vector<8x8xbf16>, vector<8x32xbf16>, vector<8x32xf32> -> vector<8x32xf32>
    %c0_3 = arith.constant 0 : index
    %c0_4 = arith.constant 0 : index
    %4 = vector.load %arg3[%c0_3, %c0_4] : memref<1x32xf32, #tpu.memory_space<vmem>>, vector<1x32xf32>
    %5 = vector.broadcast %4 : vector<1x32xf32> to vector<8x32xf32>
    %6 = arith.addf %3, %5 : vector<8x32xf32>
    %cst_5 = arith.constant 0.000000e+00 : f32
    %7 = vector.broadcast %cst_5 : f32 to vector<8x32xf32>
    %8 = arith.maximumf %6, %7 : vector<8x32xf32>
    %cst_6 = arith.constant 0.000000e+00 : f32
    %9 = vector.broadcast %cst_6 : f32 to vector<8x32xf32>
    %10 = arith.minimumf %6, %9 : vector<8x32xf32>
    %cst_7 = arith.constant 0.00999999977 : f32
    %11 = vector.broadcast %cst_7 : f32 to vector<8x32xf32>
    %12 = arith.mulf %10, %11 : vector<8x32xf32>
    %13 = arith.addf %8, %12 : vector<8x32xf32>
    %14 = arith.truncf %13 : vector<8x32xf32> to vector<8x32xbf16>
    %c0_8 = arith.constant 0 : index
    %c0_9 = arith.constant 0 : index
    %15 = vector.load %arg4[%c0_8, %c0_9] : memref<32x32xbf16, #tpu.memory_space<vmem>>, vector<32x32xbf16>
    %cst_10 = arith.constant dense<0.000000e+00> : vector<8x32xf32>
    %16 = tpu.matmul %14, %15, %cst_10 {dimension_numbers = #tpu.dot_dimension_numbers<[1], [0], [0], [1], [0, 0, 1, 1], [], []>} : vector<8x32xbf16>, vector<32x32xbf16>, vector<8x32xf32> -> vector<8x32xf32>
    %c0_11 = arith.constant 0 : index
    %c0_12 = arith.constant 0 : index
    %17 = vector.load %arg5[%c0_11, %c0_12] : memref<1x32xf32, #tpu.memory_space<vmem>>, vector<1x32xf32>
    %18 = vector.broadcast %17 : vector<1x32xf32> to vector<8x32xf32>
    %19 = arith.addf %16, %18 : vector<8x32xf32>
    %cst_13 = arith.constant 0.000000e+00 : f32
    %20 = vector.broadcast %cst_13 : f32 to vector<8x32xf32>
    %21 = arith.maximumf %19, %20 : vector<8x32xf32>
    %cst_14 = arith.constant 0.000000e+00 : f32
    %22 = vector.broadcast %cst_14 : f32 to vector<8x32xf32>
    %23 = arith.minimumf %19, %22 : vector<8x32xf32>
    %cst_15 = arith.constant 0.00999999977 : f32
    %24 = vector.broadcast %cst_15 : f32 to vector<8x32xf32>
    %25 = arith.mulf %23, %24 : vector<8x32xf32>
    %26 = arith.addf %21, %25 : vector<8x32xf32>
    %27 = arith.truncf %26 : vector<8x32xf32> to vector<8x32xbf16>
    %c0_16 = arith.constant 0 : index
    %c0_17 = arith.constant 0 : index
    %28 = vector.load %arg6[%c0_16, %c0_17] : memref<32x32xbf16, #tpu.memory_space<vmem>>, vector<32x32xbf16>
    %cst_18 = arith.constant dense<0.000000e+00> : vector<8x32xf32>
    %29 = tpu.matmul %27, %28, %cst_18 {dimension_numbers = #tpu.dot_dimension_numbers<[1], [0], [0], [1], [0, 0, 1, 1], [], []>} : vector<8x32xbf16>, vector<32x32xbf16>, vector<8x32xf32> -> vector<8x32xf32>
    %c0_19 = arith.constant 0 : index
    %c0_20 = arith.constant 0 : index
    %30 = vector.load %arg7[%c0_19, %c0_20] : memref<1x32xf32, #tpu.memory_space<vmem>>, vector<1x32xf32>
    %31 = vector.broadcast %30 : vector<1x32xf32> to vector<8x32xf32>
    %32 = arith.addf %29, %31 : vector<8x32xf32>
    %cst_21 = arith.constant 0.000000e+00 : f32
    %33 = vector.broadcast %cst_21 : f32 to vector<8x32xf32>
    %34 = arith.maximumf %32, %33 : vector<8x32xf32>
    %cst_22 = arith.constant 0.000000e+00 : f32
    %35 = vector.broadcast %cst_22 : f32 to vector<8x32xf32>
    %36 = arith.minimumf %32, %35 : vector<8x32xf32>
    %cst_23 = arith.constant 0.00999999977 : f32
    %37 = vector.broadcast %cst_23 : f32 to vector<8x32xf32>
    %38 = arith.mulf %36, %37 : vector<8x32xf32>
    %39 = arith.addf %34, %38 : vector<8x32xf32>
    %40 = arith.truncf %39 : vector<8x32xf32> to vector<8x32xbf16>
    %c0_24 = arith.constant 0 : index
    %c0_25 = arith.constant 0 : index
    %41 = vector.load %arg8[%c0_24, %c0_25] : memref<32x128xbf16, #tpu.memory_space<vmem>>, vector<32x128xbf16>
    %cst_26 = arith.constant dense<0.000000e+00> : vector<8x128xf32>
    %42 = tpu.matmul %40, %41, %cst_26 {dimension_numbers = #tpu.dot_dimension_numbers<[1], [0], [0], [1], [0, 0, 1, 1], [], []>} : vector<8x32xbf16>, vector<32x128xbf16>, vector<8x128xf32> -> vector<8x128xf32>
    %c0_27 = arith.constant 0 : index
    %c0_28 = arith.constant 0 : index
    %43 = vector.load %arg9[%c0_27, %c0_28] : memref<1x128xf32, #tpu.memory_space<vmem>>, vector<1x128xf32>
    %44 = vector.broadcast %43 : vector<1x128xf32> to vector<8x128xf32>
    %45 = arith.addf %42, %44 : vector<8x128xf32>
    %c0_29 = arith.constant 0 : index
    %c0_30 = arith.constant 0 : index
    %46 = vector.load %arg10[%c0_29, %c0_30] : memref<8x128xf32, #tpu.memory_space<vmem>>, vector<8x128xf32>
    tpu.vector_store %arg10[%c0_29, %c0_30], %45 {strides = array<i32>} : memref<8x128xf32, #tpu.memory_space<vmem>>, vector<8x128xf32>,
    return
  }
  func.func @transform_0(%arg0: i32) -> (i32, i32) {
    %c0_i32 = arith.constant 0 : i32
    %c0_i32_0 = arith.constant 0 : i32
    return %arg0, %c0_i32 : i32, i32
  }
  func.func @transform_1(%arg0: i32) -> (i32, i32) {
    %c0_i32 = arith.constant 0 : i32
    %c0_i32_0 = arith.constant 0 : i32
    %c0_i32_1 = arith.constant 0 : i32
    return %c0_i32, %c0_i32_0 : i32, i32
  }
  func.func @transform_2(%arg0: i32) -> (i32, i32) {
    %c0_i32 = arith.constant 0 : i32
    %c0_i32_0 = arith.constant 0 : i32
    %c0_i32_1 = arith.constant 0 : i32
    return %c0_i32, %c0_i32_0 : i32, i32
  }
  func.func @transform_3(%arg0: i32) -> (i32, i32) {
    %c0_i32 = arith.constant 0 : i32
    %c0_i32_0 = arith.constant 0 : i32
    %c0_i32_1 = arith.constant 0 : i32
    return %c0_i32, %c0_i32_0 : i32, i32
  }
  func.func @transform_4(%arg0: i32) -> (i32, i32) {
    %c0_i32 = arith.constant 0 : i32
    %c0_i32_0 = arith.constant 0 : i32
    %c0_i32_1 = arith.constant 0 : i32
    return %c0_i32, %c0_i32_0 : i32, i32
  }
  func.func @transform_5(%arg0: i32) -> (i32, i32) {
    %c0_i32 = arith.constant 0 : i32
    %c0_i32_0 = arith.constant 0 : i32
    %c0_i32_1 = arith.constant 0 : i32
    return %c0_i32, %c0_i32_0 : i32, i32
  }
  func.func @transform_6(%arg0: i32) -> (i32, i32) {
    %c0_i32 = arith.constant 0 : i32
    %c0_i32_0 = arith.constant 0 : i32
    %c0_i32_1 = arith.constant 0 : i32
    return %c0_i32, %c0_i32_0 : i32, i32
  }
  func.func @transform_7(%arg0: i32) -> (i32, i32) {
    %c0_i32 = arith.constant 0 : i32
    %c0_i32_0 = arith.constant 0 : i32
    %c0_i32_1 = arith.constant 0 : i32
    return %c0_i32, %c0_i32_0 : i32, i32
  }
  func.func @transform_8(%arg0: i32) -> (i32, i32) {
    %c0_i32 = arith.constant 0 : i32
    %c0_i32_0 = arith.constant 0 : i32
    %c0_i32_1 = arith.constant 0 : i32
    return %c0_i32, %c0_i32_0 : i32, i32
  }
  func.func @transform_9(%arg0: i32) -> (i32, i32) {
    %c0_i32 = arith.constant 0 : i32
    %c0_i32_0 = arith.constant 0 : i32
    return %arg0, %c0_i32 : i32, i32
  }
}

</mosaic_0001>

<bundles_post_ra>
// kernel: tpu_custom_call.1
= control target key start
LH: loop header
LB: loop body
LE: loop exit
PB: predicated region body
PF: predicated region fallthrough
CT: control target
= control target key end

     0   :  { %s1047_s0 = inlined_call_operand.vmem [shape: f32[16,8], index: 0, kind: input, shape index: {}]   ;;  %s1048_s1 = inlined_call_operand.vmem [shape: bf16[8,32], index: 1, kind: input, shape index: {}]   ;;  %s1049_s2 = inlined_call_operand.vmem [shape: f32[1,32], index: 2, kind: input, shape index: {}]   ;;  %s1050_s3 = inlined_call_operand.vmem [shape: bf16[32,32], index: 3, kind: input, shape index: {}]   ;;  %s1051_s4 = inlined_call_operand.vmem [shape: f32[1,32], index: 4, kind: input, shape index: {}]   ;;  %s1052_s5 = inlined_call_operand.hbm [shape: bf16[32,32], index: 5, kind: input, shape index: {}]   ;;  %s1053_s6 = inlined_call_operand.vmem [shape: f32[1,32], index: 6, kind: input, shape index: {}]   ;;  %s1054_s7 = inlined_call_operand.hbm [shape: bf16[32,128], index: 7, kind: input, shape index: {}]   ;;  %s1055_s8 = inlined_call_operand.vmem [shape: f32[1,128], index: 8, kind: input, shape index: {}]   ;;  %s1056_s9 = inlined_call_operand.hbm [shape: f32[16,128], index: 9, kind: output, shape index: {}]  }
   0x1   :  { %1057 = sst [smem:[#allocation11_spill]] %s1047_s0 }
   0x2   :  { %14 = vsyncpa [#allocation3], 0 }
   0x3   :  { %15 = vsyncpa [#allocation6], 0 }
   0x4   :  { %16 = vsyncpa [#allocation4], 0 }
   0x5   :  { %18 = vsyncpa [#allocation4 + $0x1], 0  ;;  %s913_s30 = smov 0   ;;  %s915_s10 = smov 0  }
   0x6   :  { %s917_s11 = smov 0   ;;  %s919_s12 = smov 0  }
   0x7 LB: > { %s934_s13 = sadd.s32 4294967295, %s857_s12   ;;  %s613_s14 = sadd.s32 4294967294, %s857_s12   ;;  %s857_s12 = sphi %s919_s12, %s1065_s12   ;;  %s853_s11 = sphi %s917_s11, %s1064_s11   ;;  %s849_s10 = sphi %s915_s10, %s1063_s10   ;;  %s845_s30 = sphi %s913_s30, %s1062_s30  }
   0x8   : > { %s938_s15 = sadd.s32 1, %s857_s12   ;;  %s225_s16 = sadd.s32 1, %s853_s11 }
   0x9   : > { %s222_s17 = ssub.s32 %s857_s12, %s938_s15  ;;  %p235_p0 = scmp.ne.s32.totalorder %s853_s11, %s849_s10 }
   0xa   : > { %p223_p1 = scmp.eq.s32.totalorder %s222_s17, 0  ;;  %p236_p2 = scmp.eq.s32.totalorder %s934_s13, 1 }
   0xb   : > { %p241_p3 = scmp.ne.s32.totalorder %s849_s10, %s845_s30  ;;  %p242_p4 = scmp.eq.s32.totalorder %s613_s14, 1 }
   0xc   : > { %s949_s18 = scalar_select %p223_p1, %s853_s11, %s225_s16  }
   0xd   : > { %p951_p5 = por %p236_p2, %p235_p0  ;;  %p955_p6 = por %p242_p4, %p241_p3 }
   0xe   : > { %p614_p7 = scmp.ge.s32.totalorder %s857_s12, 1  ;;  %p249_p8 = scmp.lt.s32.totalorder %s857_s12, 3 }
   0xf   : > { %p682_p9 = scmp.eq.s32.totalorder %s934_s13, 0  ;;  %s272_s24 = sshll.u32 %s1052_s5, 4  ;;  %s273_s24 = int_to_ptr.hbm [resolvable:$true] %s272_s24 }
  0x10   : > { %p962_p10 = pnand %p614_p7, %p249_p8  ;;  %s859_s25 = smov [#allocation2]  }
  0x11   : > { %s274_s26 = sshll.u32 %s859_s25, 4  ;;  %s289_s29 = sshll.u32 %s1054_s7, 4  ;;  %s275_s26 = int_to_ptr.vmem [resolvable:$true] %s274_s26  ;;  %s290_s29 = int_to_ptr.hbm [resolvable:$true] %s289_s29 }
  0x12   : > { %p671_p11 = pneg %p962_p10  ;;  %s860_s14 = smov 64  }
  0x13   : > { %s861_s16 = smov 4   ;;  %s862_s17 = smov [#allocation5]  }
  0x14   : > { %p672_p12 = pnand %p682_p9, %p671_p11  ;;  %s291_s22 = sshll.u32 %s862_s17, 4  ;;  %s292_s22 = int_to_ptr.vmem [resolvable:$true] %s291_s22 }
  0x15   : > { %317 = sbr.rel (%p962_p10) target bundleno = 593 (0x251), region = 56 }
  0x16   : > { %674 = dma.hbm_to_vmem [thread:$0]  (!%p672_p12), %s273_s24, 256, %s275_s26, [#allocation3], %s860_s14, %s860_s14, %s861_s16  }
  0x17   : > { %677 = dma.hbm_to_vmem [thread:$0]  (!%p672_p12), %s290_s29, 256, %s292_s22, [#allocation6], %s860_s14, %s860_s14, %s861_s16  }
  0x1a   : > { %832 = dma.done.wait (%p682_p9), [#allocation3], 256  }
  0x1b   : > { %834 = vsyncadd (%p682_p9), [#allocation3], 4294967040 }
  0x1c   : > { %836 = dma.done.wait (%p682_p9), [#allocation6], 256  }
  0x1d   : > { %838 = vsyncadd (%p682_p9), [#allocation6], 4294967040  ;;  %p358_p13 = scmp.lt.s32.totalorder %s934_s13, 1  ;;  %vm374_vm0 = vcmask 1043456   ;;  %s1061_s0 = sld [smem:[#allocation11_spill]]  ;;  %vm370_vm1 = vcmask 64512  }
  0x1e   : > { %v365_v0 = vld [vmem:[%s1048_s1] sm:$0xf]  ;;  %v656_v4 = vld [vmem:[%s1050_s3 + $0x8] sm:$0xff]  ;;  %vm416_vm2 = vcmask 261120   ;;  %v660_v26 = vld [vmem:[#allocation5 + $0x8] sm:$0xff]  ;;  %s355_s27 = sand.u32 1, %s849_s10  }
  0x1f   : > { %s359_s23 = scalar_select %p358_p13, %s934_s13, 1  ;;  %v376_v2 = vsel %vm374_vm0, %v365_v0, 0  ;;  %426 = vmatpush.bf16.msra.mxu1 %v656_v4  ;;  %v655_v5 = vld [vmem:[%s1050_s3] sm:$0xff]  ;;  %v658_v15 = vld [vmem:[#allocation2 + $0x8] sm:$0xff]  ;;  %508 = vmatpush.bf16.msra.mxu3 %v660_v26  ;;  %v659_v27 = vld [vmem:[#allocation5] sm:$0xff] }
  0x20   : > { %385 = vmatpush.bf16.msra.mxu0 %v376_v2  ;;  %v723_v6 = vld [vmem:[%s1049_s2] ss:$0 sm:$0xff]  ;;  %467 = vmatpush.bf16.msra.mxu2 %v658_v15  ;;  %s652_s28 = sshll.u32 %s934_s13, 3  ;;  %s621_s29 = sshll.u32 %s355_s27, 3 }
  0x21   : > { %s622_s24 = sshll.u32 %s359_s23, 3  ;;  %v657_v16 = vld [vmem:[#allocation2] sm:$0xff]  ;;  %s527_s17 = scalar_lea.hbm %s1056_s9, %s652_s28 }
  0x22   : > { %v724_v17 = vld [vmem:[%s1051_s4] ss:$0 sm:$0xff]  ;;  %s531_s25 = sshll.u32 %s527_s17, 4  ;;  %s807_s16 = scalar_lea.hbm %s1056_s9, 16  ;;  %s532_s25 = int_to_ptr.hbm [resolvable:$true] %s531_s25 }
  0x23   : > { %s361_s26 = scalar_lea.vmem %s1061_s0, %s622_s24  ;;  %427 = vmatpush.bf16.msra.mxu1 %v655_v5  ;;  %509 = vmatpush.bf16.msra.mxu3 %v659_v27  ;;  %v725_v28 = vld [vmem:[%s1053_s6] ss:$0 sm:$0xff]  ;;  %s357_s24 = scalar_lea.vmem [#allocation7], %s621_s29 }
  0x24   : > { %v363_v1 = vld [vmem:[%s361_s26] sm:$0xff]  ;;  %468 = vmatpush.bf16.msra.mxu2 %v657_v16  ;;  %s529_s21 = sshll.u32 %s357_s24, 4  ;;  %s517_s26 = scalar_lea.sflag [#allocation4], %s355_s27  ;;  %s530_s21 = int_to_ptr.vmem [resolvable:$true] %s529_s21 }
  0x25   : > { %v364_v3 = vpack.c.bf16 %v363_v1, %v363_v1  ;;  %v726_v37 = vld [vmem:[%s1055_s8] ss:$0 sm:$0xff]  ;;  %s801_s13 = sshra.s32 %s532_s25, 4  ;;  %s802_s13 = int_to_ptr.hbm [resolvable:$true] %s801_s13 }
  0x26   : > { %s803_s0 = scalar_lea.hbm %s802_s13, 8  ;;  %p808_p3 = scmp.lt.s32.totalorder %s802_s13, %s1056_s9 }
  0x27   : > { %623 = vmatmul.msk.bf16.vlgmr.msra.gmra.mxu0 %vm370_vm1, %v364_v3  ;;  %p804_p0 = scmp.ne.s32.totalorder %s802_s13, %s803_s0  ;;  %p809_p4 = scmp.lt.s32.totalorder %s807_s16, %s803_s0 }
  0x29   : > { %p805_p1 = pnand %p804_p0, %p951_p5  ;;  %p810_p7 = por %p809_p4, %p808_p3 }
  0x2b   : > { %p806_p2 = pneg %p805_p1 }
  0x2d   : > { %p811_p8 = pnand %p810_p7, %p806_p2 }
  0xa4   : > { %v387_v7 = vpop.f32.mrf.mxu0 }
  0xa5   : > { %v388_v8 = vadd.f32 %v723_v6, %v387_v7 }
  0xa7   : > { %v392_v9 = vmin.f32 %v388_v8, 0.0  ;;  %v391_v10 = vmax.f32 %v388_v8, 0.0 }
  0xa9   : > { %v393_v11 = vmul.f32 0.01, %v392_v9 }
  0xab   : > { %v394_v12 = vadd.f32 %v393_v11, %v391_v10 }
  0xac   : > { %v389_v13 = vpop.f32.mrf.mxu0 }
  0xad   : > { %v395_v14 = vpack.c.bf16 %v394_v12, %v394_v12 }
  0xaf   : > { %632 = vmatmul.msk.bf16.vlgmr.msra.gmra.mxu1 %vm416_vm2, %v395_v14 }
 0x12c   : > { %v429_v18 = vpop.f32.mrf.mxu1 }
 0x12d   : > { %v430_v19 = vadd.f32 %v724_v17, %v429_v18 }
 0x12f   : > { %v434_v20 = vmin.f32 %v430_v19, 0.0  ;;  %v433_v21 = vmax.f32 %v430_v19, 0.0 }
 0x131   : > { %v435_v22 = vmul.f32 0.01, %v434_v20 }
 0x133   : > { %v436_v23 = vadd.f32 %v435_v22, %v433_v21 }
 0x134   : > { %v431_v24 = vpop.f32.mrf.mxu1 }
 0x135   : > { %v437_v25 = vpack.c.bf16 %v436_v23, %v436_v23 }
 0x137   : > { %641 = vmatmul.msk.bf16.vlgmr.msra.gmra.mxu2 %vm416_vm2, %v437_v25 }
 0x1ba   : > { %v470_v29 = vpop.f32.mrf.mxu2 }
 0x1bb   : > { %v471_v30 = vadd.f32 %v725_v28, %v470_v29 }
 0x1bd   : > { %v475_v31 = vmin.f32 %v471_v30, 0.0  ;;  %v474_v32 = vmax.f32 %v471_v30, 0.0 }
 0x1bf   : > { %v476_v33 = vmul.f32 0.01, %v475_v31 }
 0x1c1   : > { %v477_v34 = vadd.f32 %v476_v33, %v474_v32 }
 0x1c2   : > { %v472_v35 = vpop.f32.mrf.mxu2 }
 0x1c3   : > { %v478_v36 = vpack.c.bf16 %v477_v34, %v477_v34 }
 0x1c5   : > { %650 = vmatmul.msk.bf16.vlgmr.msra.gmra.mxu3 %vm416_vm2, %v478_v36 }
 0x248   : > { %v511_v38 = vpop.f32.mrf.mxu3 }
 0x249   : > { %v512_v39 = vadd.f32 %v726_v37, %v511_v38 }
 0x24b   : > { %515 = vst [vmem:[%s357_s24] sm:$0xff] %v512_v39 }
 0x24c   : > { %814 = shalt.err (!%p811_p8)
}
 0x24d   : > { %669 = dma.vmem_to_hbm [thread:$0]  (%p951_p5), %s530_s21, 128, %s532_s25, %s517_s26  }
 0x250   : > { %v513_v40 = vpop.f32.mrf.mxu3 }
 0x251 PF: > { %p686_p9 = scmp.ge.s32.totalorder %s857_s12, 2  ;;  %s543_s27 = sand.u32 1, %s845_s30  }
 0x252   : > { %s544_s17 = scalar_lea.sflag [#allocation4], %s543_s27 }
 0x253   : > { %p679_p10 = pnand %p686_p9, %p955_p6 }
 0x255   : > { %p680_p11 = pneg %p679_p10 }
 0x257   : > { %840 = dma.done.wait (%p680_p11), %s544_s17, 128  }
 0x258   : > { %842 = vsyncadd (%p680_p11), %s544_s17, 4294967168  ;;  %p21_p12 = scmp.ge.s32.totalorder %s938_s15, 4   ;;  %s1062_s30 = smov %s849_s10 }
 0x259   : > { %s1063_s10 = smov %s853_s11  ;;  %s1064_s11 = smov %s949_s18 }
 0x25a   : > { %s1065_s12 = smov %s938_s15  ;;  %23 = sbr.rel (!%p21_p12) target bundleno = 7 (0x7), region = 100 }
 0x25f   :  { %550 = vsyncpa [#allocation3], 1 }
 0x260   :  { %552 = vsyncpa [#allocation3 + $0x1], 1 }
 0x261   :  { %553 = vsyncpa [#allocation6], 1 }
 0x262   :  { %554 = vsyncpa [#allocation4], 1 }
 0x263   :  { %556 = vsyncpa [#allocation4 + $0x1], 1 }

</bundles_post_ra>
